<compile_context>
chip_gen: v7x
topology: tpu7x:2x2x1
jax: 0.10.0
libtpu: 0.0.40
codegen_flags: <defaults>
</compile_context>

<pallas_src>
import math
import functools

import jax
import jax.numpy as jnp
from jax.experimental import pallas as pl
from jax.experimental.pallas import tpu as pltpu

_GELU_C = math.sqrt(2.0 / math.pi)


def _gelu_f32(h):
    h2 = h * h  # reuse h*h instead of h**3
    return 0.5 * h * (1.0 + jnp.tanh(_GELU_C * h * (1.0 + 0.044715 * h2)))


def _mlp_kernel_fused(x_ref, w_ref, b_ref, o_ref, *, compute_dtype):
    """Single-shot tile (K collapsed): o = gelu(x @ w + b)."""
    x = x_ref[...].astype(compute_dtype)  # f32 -> bf16 cast fused into the kernel
    h = jnp.dot(x, w_ref[...], preferred_element_type=jnp.float32)
    o_ref[...] = _gelu_f32(h + b_ref[...]).astype(o_ref.dtype)


def _mlp_kernel_kred(x_ref, w_ref, b_ref, o_ref, acc_ref, *, compute_dtype):
    """Fallback with K reduction axis: grid = (M/tm, N/tn, K/tk), K last."""
    k = pl.program_id(2)

    @pl.when(k == 0)
    def _init():
        acc_ref[...] = jnp.zeros_like(acc_ref)

    acc_ref[...] += jnp.dot(
        x_ref[...].astype(compute_dtype), w_ref[...],
        preferred_element_type=jnp.float32)

    @pl.when(k == pl.num_programs(2) - 1)
    def _finalize():
        o_ref[...] = _gelu_f32(acc_ref[...] + b_ref[...]).astype(o_ref.dtype)


def _round_up(x, m):
    return (x + m - 1) // m * m


def _vmem_capacity_bytes():
    """Generation-aware VMEM capacity (128 MiB v5e/v6e, 64 MiB per-TC v7x)."""
    try:
        cap = getattr(pltpu.get_tpu_info(), "vmem_capacity_bytes", None)
        if cap:
            return int(cap)
    except Exception:
        pass
    return 64 << 20  # conservative fallback (v7x per-TC VMEM)


@functools.partial(
    jax.jit, static_argnames=("tile_m", "tile_n", "tile_k", "compute_dtype")
)
def mlp_layer(
    x,
    w,
    b,
    *,
    tile_m=512,
    tile_n=1024,
    tile_k=4096,
    compute_dtype=jnp.bfloat16,
):
    """x: (B, S, K), w: (K, N), b: (N,). Returns gelu(x @ w + b): (B, S, N)."""
    B, S, K = x.shape
    Kw, N = w.shape
    assert K == Kw, "weight input dim mismatch"
    M = B * S
    out_dtype = x.dtype
    compute_dtype = jnp.dtype(compute_dtype)

    x_sz = jnp.dtype(x.dtype).itemsize
    c_sz = compute_dtype.itemsize
    o_sz = jnp.dtype(out_dtype).itemsize

    # Sublane alignment of the x / output tiles follows the stored dtype.
    m_align = max(8, 32 // x_sz)  # f32 -> 8, bf16 -> 16, int8 -> 32

    Kp = _round_up(K, 128)
    Np = _round_up(N, 128)

    vmem_cap = _vmem_capacity_bytes()
    budget = int(vmem_cap * 0.6)  # working budget for double-buffered tiles

    # ----- static tile selection -----
    collapse_k = Kp <= max(tile_k, 128)       # single-shot matmul per tile
    tk = Kp if collapse_k else min(_round_up(tile_k, 128), Kp)
    tm = _round_up(min(tile_m, _round_up(M, m_align)), m_align)
    tn = min(_round_up(tile_n, 128), Np)

    def tile_bytes(tm_, tn_, tk_, with_acc):
        return (2 * tm_ * tk_ * x_sz          # x tile (double-buffered, orig dtype)
                + 2 * tk_ * tn_ * c_sz        # weight tile
                + 2 * tn_ * 4                 # bias tile (f32)
                + 2 * tm_ * tn_ * o_sz        # output tile
                + (tm_ * tn_ * 4 if with_acc else 0))

    if collapse_k and tile_bytes(tm, Np, tk, False) <= budget:
        tn = Np  # whole (K, N) weight resident in VMEM; x streamed exactly once
    else:
        # Shrink tiles until the double-buffered footprint fits the VMEM budget.
        while tile_bytes(tm, tn, tk, not collapse_k) > budget:
            if tn > 128:
                tn = max(128, _round_up(tn // 2, 128))
            elif tm > m_align:
                tm = max(m_align, _round_up(tm // 2, m_align))
            elif tk > 128:
                tk = max(128, _round_up(tk // 2, 128))
                collapse_k = tk >= Kp
            else:
                break

    Mp = _round_up(M, tm)
    Npad = _round_up(N, tn)
    Kpad = _round_up(K, tk)

    # x stays in its original dtype (cast happens on-chip); only the (small,
    # one-time) weight/bias are converted in the wrapper.
    x2 = x.reshape(M, K)
    w2 = w.astype(compute_dtype)
    b2 = b.reshape(1, N).astype(jnp.float32)

    if (Mp, Kpad) != (M, K):
        x2 = jnp.pad(x2, ((0, Mp - M), (0, Kpad - K)))
    if (Kpad, Npad) != (K, N):
        w2 = jnp.pad(w2, ((0, Kpad - K), (0, Npad - N)))
    if Npad != N:
        b2 = jnp.pad(b2, ((0, 0), (0, Npad - N)))

    needed = tile_bytes(tm, tn, tk, not collapse_k)
    vmem_limit = min(int(vmem_cap * 0.85),
                     max(int(needed * 1.4) + (4 << 20), 32 << 20))
    vmem_limit = max(vmem_limit, needed + (2 << 20))

    cost = pl.CostEstimate(
        flops=2 * Mp * Npad * Kpad,
        transcendentals=Mp * Npad,  # tanh per output element
        bytes_accessed=(Mp * Kpad * x_sz + Kpad * Npad * c_sz
                        + Npad * 4 + Mp * Npad * o_sz),
    )

    if collapse_k:
        # grid = (N blocks [outer], M blocks [inner]); the weight/bias blocks
        # depend only on the outer axis, so each weight tile is DMA'd once and
        # reused across the whole inner M loop (read once total when tn == Np).
        grid = (Npad // tn, Mp // tm)
        kernel = functools.partial(_mlp_kernel_fused, compute_dtype=compute_dtype)
        grid_spec = pltpu.PrefetchScalarGridSpec(
            num_scalar_prefetch=0,
            grid=grid,
            in_specs=[
                pl.BlockSpec((tm, tk), lambda j, i: (i, 0)),   # x rows tile
                pl.BlockSpec((tk, tn), lambda j, i: (0, j)),   # weight tile
                pl.BlockSpec((1, tn), lambda j, i: (0, j)),    # bias tile
            ],
            out_specs=pl.BlockSpec((tm, tn), lambda j, i: (i, j)),
            scratch_shapes=[],
        )
        dims = ("parallel", "parallel")
    else:
        # K too large for a single tile: keep the reduction axis last with an
        # f32 VMEM accumulator; bias + gelu applied once in the finalize branch.
        grid = (Mp // tm, Npad // tn, Kpad // tk)
        kernel = functools.partial(_mlp_kernel_kred, compute_dtype=compute_dtype)
        grid_spec = pltpu.PrefetchScalarGridSpec(
            num_scalar_prefetch=0,
            grid=grid,
            in_specs=[
                pl.BlockSpec((tm, tk), lambda i, j, k: (i, k)),
                pl.BlockSpec((tk, tn), lambda i, j, k: (k, j)),
                pl.BlockSpec((1, tn), lambda i, j, k: (0, j)),
            ],
            out_specs=pl.BlockSpec((tm, tn), lambda i, j, k: (i, j)),
            scratch_shapes=[pltpu.VMEM((tm, tn), jnp.float32)],
        )
        dims = ("parallel", "parallel", "arbitrary")

    out_padded = pl.pallas_call(
        kernel,
        out_shape=jax.ShapeDtypeStruct((Mp, Npad), out_dtype),
        grid_spec=grid_spec,
        compiler_params=pltpu.CompilerParams(
            dimension_semantics=dims,
            vmem_limit_bytes=vmem_limit,
        ),
        cost_estimate=cost,
    )(x2, w2, b2)

    # TODO(synk): nn.Dropout(0.1) is evaluated as identity (eval mode).
    return out_padded[:M, :N].reshape(B, S, N)


def _reference(x, w, b, compute_dtype=jnp.float32):
    xc = x.astype(compute_dtype).astype(jnp.float32)
    wc = w.astype(compute_dtype).astype(jnp.float32)
    h = jnp.einsum("bsk,kn->bsn", xc, wc, preferred_element_type=jnp.float32)
    h = h + b.astype(jnp.float32)
    return 0.5 * h * (1.0 + jnp.tanh(_GELU_C * (h + 0.044715 * h**3)))


if __name__ == "__main__":
    key = jax.random.PRNGKey(0)
    kx, kw, kb, kx2, kw2, kb2 = jax.random.split(key, 6)

    # Small shapes consistent with the module: batch=2, seq=8, in=32, out=128.
    B, S, K, N = 2, 8, 32, 128
    x = jax.random.normal(kx, (B, S, K), dtype=jnp.float32)
    # GPT-2 Conv1D init: normal(std=0.02) weight, small bias.
    w = jax.random.normal(kw, (K, N), dtype=jnp.float32) * 0.02
    b = jax.random.normal(kb, (N,), dtype=jnp.float32) * 0.02

    # 1) f32 compute path (collapsed-K, weight-resident kernel): tight match.
    out_f32 = jax.block_until_ready(mlp_layer(x, w, b, compute_dtype=jnp.float32))
    ref_f32 = _reference(x, w, b, compute_dtype=jnp.float32)
    assert out_f32.shape == (B, S, N)
    assert jnp.allclose(out_f32, ref_f32, atol=1e-5, rtol=1e-5), "f32 mismatch"

    # 2) Default bf16 matmul path (f32 accumulation): looser tolerance.
    out_bf16 = jax.block_until_ready(mlp_layer(x, w, b))
    ref_bf16 = _reference(x, w, b, compute_dtype=jnp.bfloat16)
    assert out_bf16.shape == (B, S, N)
    assert jnp.allclose(out_bf16, ref_bf16, atol=2e-3, rtol=2e-2), "bf16 mismatch"

    # 3) Force the K-reduction fallback path (small tiles, multiple N/K blocks).
    K2, N2 = 384, 256
    x2 = jax.random.normal(kx2, (B, S, K2), dtype=jnp.float32)
    w2 = jax.random.normal(kw2, (K2, N2), dtype=jnp.float32) * 0.02
    b2 = jax.random.normal(kb2, (N2,), dtype=jnp.float32) * 0.02
    out_kred = jax.block_until_ready(
        mlp_layer(x2, w2, b2, tile_k=128, tile_n=128, compute_dtype=jnp.float32)
    )
    ref_kred = _reference(x2, w2, b2, compute_dtype=jnp.float32)
    assert out_kred.shape == (B, S, N2)
    assert jnp.allclose(out_kred, ref_kred, atol=1e-4, rtol=1e-4), "kred mismatch"

    print("KERNEL_OK")
</pallas_src>

<mosaic_0001>
module attributes {stable_mosaic.version = 11 : i64} {
  func.func @_mlp_kernel_fused(%arg0: i32, %arg1: i32, %arg2: memref<16x128xf32, #tpu.memory_space<vmem>>, %arg3: memref<128x128xf32, #tpu.memory_space<vmem>>, %arg4: memref<1x128xf32, #tpu.memory_space<vmem>>, %arg5: memref<16x128xf32, #tpu.memory_space<vmem>>) attributes {dimension_semantics = [#tpu.dimension_semantics<parallel>, #tpu.dimension_semantics<parallel>], iteration_bounds = array<i64: 1, 1>, scalar_prefetch = 0 : i64, scratch_operands = 0 : i64, tpu.core_type = #tpu.core_type<tc>, window_params = [{transform_indices = @transform_0, window_bounds = array<i64: 16, 128>}, {transform_indices = @transform_1, window_bounds = array<i64: 128, 128>}, {transform_indices = @transform_2, window_bounds = array<i64: 1, 128>}, {transform_indices = @transform_3, window_bounds = array<i64: 16, 128>}]} {
    %c0 = arith.constant 0 : index
    %c0_0 = arith.constant 0 : index
    %0 = vector.load %arg2[%c0, %c0_0] : memref<16x128xf32, #tpu.memory_space<vmem>>, vector<16x128xf32>
    %c0_1 = arith.constant 0 : index
    %c0_2 = arith.constant 0 : index
    %1 = vector.load %arg3[%c0_1, %c0_2] : memref<128x128xf32, #tpu.memory_space<vmem>>, vector<128x128xf32>
    %cst = arith.constant dense<0.000000e+00> : vector<16x128xf32>
    %2 = tpu.matmul %0, %1, %cst {dimension_numbers = #tpu.dot_dimension_numbers<[1], [0], [0], [1], [0, 0, 1, 1], [], []>} : vector<16x128xf32>, vector<128x128xf32>, vector<16x128xf32> -> vector<16x128xf32>
    %c0_3 = arith.constant 0 : index
    %c0_4 = arith.constant 0 : index
    %3 = vector.load %arg4[%c0_3, %c0_4] : memref<1x128xf32, #tpu.memory_space<vmem>>, vector<1x128xf32>
    %4 = vector.broadcast %3 : vector<1x128xf32> to vector<16x128xf32>
    %5 = arith.addf %2, %4 : vector<16x128xf32>
    %6 = arith.mulf %5, %5 : vector<16x128xf32>
    %cst_5 = arith.constant 5.000000e-01 : f32
    %7 = vector.broadcast %cst_5 : f32 to vector<16x128xf32>
    %8 = arith.mulf %7, %5 : vector<16x128xf32>
    %cst_6 = arith.constant 0.797884583 : f32
    %9 = vector.broadcast %cst_6 : f32 to vector<16x128xf32>
    %10 = arith.mulf %9, %5 : vector<16x128xf32>
    %cst_7 = arith.constant 4.471500e-02 : f32
    %11 = vector.broadcast %cst_7 : f32 to vector<16x128xf32>
    %12 = arith.mulf %11, %6 : vector<16x128xf32>
    %cst_8 = arith.constant 1.000000e+00 : f32
    %13 = vector.broadcast %cst_8 : f32 to vector<16x128xf32>
    %14 = arith.addf %13, %12 : vector<16x128xf32>
    %15 = arith.mulf %10, %14 : vector<16x128xf32>
    %16 = math.tanh %15 : vector<16x128xf32>
    %cst_9 = arith.constant 1.000000e+00 : f32
    %17 = vector.broadcast %cst_9 : f32 to vector<16x128xf32>
    %18 = arith.addf %17, %16 : vector<16x128xf32>
    %19 = arith.mulf %8, %18 : vector<16x128xf32>
    %c0_10 = arith.constant 0 : index
    %c0_11 = arith.constant 0 : index
    %20 = vector.load %arg5[%c0_10, %c0_11] : memref<16x128xf32, #tpu.memory_space<vmem>>, vector<16x128xf32>
    tpu.vector_store %arg5[%c0_10, %c0_11], %19 {strides = array<i32>} : memref<16x128xf32, #tpu.memory_space<vmem>>, vector<16x128xf32>,
    return
  }
  func.func @transform_0(%arg0: i32, %arg1: i32) -> (i32, i32) {
    %c0_i32 = arith.constant 0 : i32
    %c0_i32_0 = arith.constant 0 : i32
    return %arg1, %c0_i32 : i32, i32
  }
  func.func @transform_1(%arg0: i32, %arg1: i32) -> (i32, i32) {
    %c0_i32 = arith.constant 0 : i32
    %c0_i32_0 = arith.constant 0 : i32
    return %c0_i32, %arg0 : i32, i32
  }
  func.func @transform_2(%arg0: i32, %arg1: i32) -> (i32, i32) {
    %c0_i32 = arith.constant 0 : i32
    %c0_i32_0 = arith.constant 0 : i32
    return %c0_i32, %arg0 : i32, i32
  }
  func.func @transform_3(%arg0: i32, %arg1: i32) -> (i32, i32) {
    %c0_i32 = arith.constant 0 : i32
    return %arg1, %arg0 : i32, i32
  }
}

</mosaic_0001>

<bundles_post_ra>
// kernel: mlp_layer.1
= control target key start
LH: loop header
LB: loop body
LE: loop exit
PB: predicated region body
PF: predicated region fallthrough
CT: control target
= control target key end

     0   :  { %s360_s0 = inlined_call_operand.vmem [shape: f32[16,128], index: 0, kind: input, shape index: {}]   ;;  %s361_s1 = inlined_call_operand.vmem [shape: f32[128,128], index: 1, kind: input, shape index: {}]   ;;  %s362_s2 = inlined_call_operand.vmem [shape: f32[1,128], index: 2, kind: input, shape index: {}]   ;;  %s363_s3 = inlined_call_operand.hbm [shape: f32[16,128], index: 3, kind: output, shape index: {}]  }
   0x1   :  { %v17_v0 = vld [vmem:[%s361_s1] sm:$0xff]  ;;  %v18_v1 = vld [vmem:[%s361_s1 + $0x8] sm:$0xff]  ;;  %v19_v2 = vld [vmem:[%s361_s1 + $0x10] sm:$0xff] }
   0x2   :  { %v205_v3 = vpack.c.bf16 %v18_v1, %v17_v0  ;;  %v20_v4 = vld [vmem:[%s361_s1 + $0x18] sm:$0xff]  ;;  %v21_v6 = vld [vmem:[%s361_s1 + $0x20] sm:$0xff]  ;;  %v22_v7 = vld [vmem:[%s361_s1 + $0x28] sm:$0xff] }
   0x3   :  { %v209_v5 = vpack.c.bf16 %v20_v4, %v19_v2  ;;  %v213_v8 = vpack.c.bf16 %v22_v7, %v21_v6  ;;  %v15_v9 = vld [vmem:[%s360_s0] sm:$0xff]  ;;  %v23_v10 = vld [vmem:[%s361_s1 + $0x30] sm:$0xff]  ;;  %v24_v11 = vld [vmem:[%s361_s1 + $0x38] sm:$0xff] }
   0x4   :  { %206 = vmatprep.subr.bf16.mxu0 %v205_v3  ;;  %202 = vmatprep.mubr.f32.mxu0 %v15_v9 }
   0x5   :  { %208 = vmatpush3.bf16.msra.mxu0 %v205_v3 }
   0x6   :  { %210 = vmatprep.subr.bf16.mxu0 %v209_v5 }
   0x7   :  { %8 = vsyncpa [#allocation3], 0  ;;  %v217_v12 = vpack.c.bf16 %v24_v11, %v23_v10  ;;  %v25_v13 = vld [vmem:[%s361_s1 + $0x40] sm:$0xff]  ;;  %v26_v14 = vld [vmem:[%s361_s1 + $0x48] sm:$0xff] }
   0x8   :  { %v221_v15 = vpack.c.bf16 %v26_v14, %v25_v13  ;;  %v27_v16 = vld [vmem:[%s361_s1 + $0x50] sm:$0xff]  ;;  %v28_v17 = vld [vmem:[%s361_s1 + $0x58] sm:$0xff]  ;;  %v29_v19 = vld [vmem:[%s361_s1 + $0x60] sm:$0xff] }
   0x9   :  { %212 = vmatpush3.bf16.msra.mxu0 %v209_v5  ;;  %v225_v18 = vpack.c.bf16 %v28_v17, %v27_v16  ;;  %v30_v20 = vld [vmem:[%s361_s1 + $0x68] sm:$0xff]  ;;  %v31_v22 = vld [vmem:[%s361_s1 + $0x70] sm:$0xff]  ;;  %v32_v23 = vld [vmem:[%s361_s1 + $0x78] sm:$0xff] }
   0xa   :  { %214 = vmatprep.subr.bf16.mxu0 %v213_v8  ;;  %v229_v21 = vpack.c.bf16 %v30_v20, %v29_v19  ;;  %v233_v24 = vpack.c.bf16 %v32_v23, %v31_v22  ;;  %v16_v25 = vld [vmem:[%s360_s0 + $0x8] sm:$0xff]  ;;  %v151_v26 = vld [vmem:[%s362_s2] ss:$0 sm:$0xff]  ;;  %s268_s0 = smov [#allocation2]  }
   0xb   :  { %s140_s1 = sshll.u32 %s268_s0, 4  ;;  %s141_s1 = int_to_ptr.vmem [resolvable:$true] %s140_s1 }
   0xc   :  { %s244_s2 = scalar_lea.vmem %s141_s1, 256  ;;  %p249_p1 = scmp.lt.s32.totalorder %s141_s1, %s141_s1 }
   0xd   :  { %216 = vmatpush3.bf16.msra.mxu0 %v213_v8  ;;  %p245_p0 = scmp.ne.s32.totalorder %s141_s1, %s244_s2  ;;  %p250_p2 = scmp.lt.s32.totalorder %s244_s2, %s244_s2 }
   0xe   :  { %218 = vmatprep.subr.bf16.mxu0 %v217_v12 }
   0xf   :  { %p251_p3 = por %p250_p2, %p249_p1 }
  0x11   :  { %220 = vmatpush3.bf16.msra.mxu0 %v217_v12  ;;  %p252_p4 = pnand %p251_p3, %p245_p0 }
  0x12   :  { %222 = vmatprep.subr.bf16.mxu0 %v221_v15 }
  0x15   :  { %224 = vmatpush3.bf16.msra.mxu0 %v221_v15 }
  0x16   :  { %226 = vmatprep.subr.bf16.mxu0 %v225_v18 }
  0x19   :  { %228 = vmatpush3.bf16.msra.mxu0 %v225_v18 }
  0x1a   :  { %230 = vmatprep.subr.bf16.mxu0 %v229_v21 }
  0x1d   :  { %232 = vmatpush3.bf16.msra.mxu0 %v229_v21 }
  0x1e   :  { %234 = vmatprep.subr.bf16.mxu0 %v233_v24 }
  0x21   :  { %236 = vmatpush3.bf16.msra.mxu0 %v233_v24 }
  0x24   :  { %203 = vmatmul.mubr.f32.vlgmr.msra.gmra.mrb[0].mxu0 %v16_v25 }
  0xf7   :  { %v204_v27 = vpop.f32.mrb[0].mxu0 }
  0xf8   :  { %v112_v28 = vadd.f32 %v204_v27, %v151_v26  ;;  %v106_v29 = vpop.f32.mrb[1].mxu0 }
  0xf9   :  { %v107_v30 = vadd.f32 %v151_v26, %v106_v29 }
  0xfa   :  { %v116_v31 = vmul.f32 %v112_v28, %v112_v28  ;;  %v120_v35 = vmul.f32 0.7978846, %v112_v28  ;;  %v118_v43 = vmul.f32 0.5, %v112_v28 }
  0xfb   :  { %v115_v32 = vmul.f32 %v107_v30, %v107_v30  ;;  %v119_v37 = vmul.f32 0.7978846, %v107_v30  ;;  %v117_v45 = vmul.f32 0.5, %v107_v30 }
  0xfc   :  { %v122_v33 = vmul.f32 0.044715, %v116_v31 }
  0xfd   :  { %v121_v34 = vmul.f32 0.044715, %v115_v32 }
  0xfe   :  { %v124_v36 = vadd.f32 1.0, %v122_v33 }
  0xff   :  { %v123_v38 = vadd.f32 1.0, %v121_v34 }
 0x100   :  { %v126_v39 = vmul.f32 %v124_v36, %v120_v35 }
 0x101   :  { %v125_v40 = vmul.f32 %v123_v38, %v119_v37 }
 0x102   :  { %240 = vtanh.f32 %v126_v39 }
 0x103   :  { %242 = vtanh.f32 %v125_v40 }
 0x10c   :  { %v241_v41 = vpop.eup %240 }
 0x10d   :  { %v243_v42 = vpop.eup %242  ;;  %v130_v44 = vadd.f32 1.0, %v241_v41 }
 0x10e   :  { %v129_v46 = vadd.f32 1.0, %v243_v42 }
 0x10f   :  { %v132_v47 = vmul.f32 %v130_v44, %v118_v43 }
 0x110   :  { %v131_v48 = vmul.f32 %v129_v46, %v117_v45 }
 0x111   :  { %134 = vst [vmem:[#allocation2 + $0x8] sm:$0xff] %v132_v47 }
 0x112   :  { %133 = vst [vmem:[#allocation2] sm:$0xff] %v131_v48 }
 0x113   :  { %255 = shalt.err (!%p252_p4)
}
 0x114   :  { %s256_s25 = scalar_lea.hbm %s363_s3, 256 }
 0x115   :  { %p257_p5 = scmp.ne.s32.totalorder %s363_s3, %s256_s25  ;;  %p260_p6 = scmp.lt.u32.totalorder %s256_s25, %s363_s3 }
 0x117   :  { %p262_p7 = pnand %p260_p6, %p257_p5 }
 0x119   :  { %265 = shalt.err (!%p262_p7)
}
 0x11a   :  { %s269_s30 = smov 128   ;;  %s270_s4 = smov 8  }
 0x11b   :  { %146 = dma.vmem_to_hbm [thread:$0]  %s141_s1, 256, %s363_s3, [#allocation3], %s269_s30, %s269_s30, %s270_s4  }
 0x11c   :  { %266 = dma.done.wait [#allocation3], 256  }
 0x11d   :  { %267 = vsyncadd [#allocation3], 4294967040 }
 0x11e   :  { %150 = vsyncpa [#allocation3], 1 }

</bundles_post_ra>
